<compile_context>
chip_gen: v7x
topology: tpu7x:2x2x1
jax: 0.10.0
libtpu: 0.0.40
codegen_flags: <defaults>
</compile_context>

<pallas_src>
import functools

import jax
import jax.numpy as jnp
from jax.experimental import pallas as pl
from jax.experimental.pallas import tpu as pltpu

SELU_ALPHA = 1.6732632423543772
SELU_SCALE = 1.0507009873554805


def san_kernel(x_ref, whc_ref, bhc_ref, w2_ref, b2_ref, w3_ref, b3_ref, o_ref,
               *, num_heads, d):
    x = x_ref[...]                                             # (TB, D) f32
    xb = x.astype(jnp.bfloat16)                                # bf16 MXU operand

    # --- all attention heads in ONE MXU push: (TB, NH*D), f32 accumulate ---
    logits_all = jnp.dot(xb, whc_ref[...], preferred_element_type=jnp.float32)
    logits_all = logits_all + bhc_ref[...]                     # single f32 bias add

    # --- per-head softmax(axis=1) * x, elementwise max over heads + zeros ---
    placeholder = jnp.zeros_like(x)
    for h in range(num_heads):                                 # static unroll (NH=2)
        logits = logits_all[:, h * d:(h + 1) * d]              # static lane slice
        m = jnp.max(logits, axis=1, keepdims=True)
        e = jnp.exp(logits - m)
        denom = jnp.sum(e, axis=1, keepdims=True)
        sm = e / denom                                         # exact divide (review)
        placeholder = jnp.maximum(placeholder, sm * x)

    # --- fc2 (bf16 operands, f32 accumulate) ---
    h2 = jnp.dot(placeholder.astype(jnp.bfloat16), w2_ref[...],
                 preferred_element_type=jnp.float32)
    h2 = h2 + b2_ref[...]                                      # (TB, H) f32

    # --- dropout (inference -> identity), SELU (clamped exp branch, no inf) ---
    act = SELU_SCALE * jnp.where(
        h2 > 0, h2, SELU_ALPHA * (jnp.exp(jnp.minimum(h2, 0.0)) - 1.0))

    # --- fc3 (weights zero-padded to lane-dense C_pad; bf16 operands) ---
    out = jnp.dot(act.astype(jnp.bfloat16), w3_ref[...],
                  preferred_element_type=jnp.float32)
    out = out + b3_ref[...]                                    # (TB, C_pad) f32

    o_ref[...] = out.astype(o_ref.dtype)


def prepare_params(params):
    """One-time weight prep (hoisted out of the forward hot path).

    Fuses the per-head weights into a single wide matrix, pads fc3 to a
    lane-dense output width, and casts the matmul weights to bf16.
    Returns a dict of arrays only (jit-friendly as a traced argument).
    """
    wh, bh = params["wh"], params["bh"]          # (NH, D, D), (NH, 1, D)
    w2, b2 = params["w2"], params["b2"]          # (D, H), (1, H)
    w3, b3 = params["w3"], params["b3"]          # (H, C), (1, C)
    num_heads, D, _ = wh.shape
    C = w3.shape[1]
    C_pad = ((C + 127) // 128) * 128

    whc = jnp.concatenate([wh[h] for h in range(num_heads)], axis=1)  # (D, NH*D)
    bhc = jnp.concatenate([bh[h] for h in range(num_heads)], axis=1)  # (1, NH*D)
    w3p = jnp.pad(w3, ((0, 0), (0, C_pad - C)))                       # (H, C_pad)
    b3p = jnp.pad(b3, ((0, 0), (0, C_pad - C)))                       # (1, C_pad)

    return {
        "whc": whc.astype(jnp.bfloat16),
        "bhc": bhc.astype(jnp.float32),
        "w2": w2.astype(jnp.bfloat16),
        "b2": b2.astype(jnp.float32),
        "w3p": w3p.astype(jnp.bfloat16),
        "b3p": b3p.astype(jnp.float32),
    }


def _default_batch_tile(B):
    # Small batches: one grid step (per-step overhead dominates).
    # Large batches: cap the tile so intermediates stay vreg-resident, x/out
    # tiles pipeline, and v7x's 2 TensorCores get >=2 "parallel" grid steps.
    if B <= 512:
        return B
    for t in (512, 256, 128):
        if B % t == 0:
            return t
    return B


def san_forward(x, fused, num_classes, *, batch_tile=None, trim_output=True):
    """x: (B, D) float32.  fused: output of prepare_params (arrays only)."""
    B, D = x.shape
    whc, bhc = fused["whc"], fused["bhc"]
    w2, b2 = fused["w2"], fused["b2"]
    w3p, b3p = fused["w3p"], fused["b3p"]
    num_heads = whc.shape[1] // D
    H = w2.shape[1]
    C_pad = w3p.shape[1]

    if batch_tile is None:
        batch_tile = _default_batch_tile(B)
    assert B % batch_tile == 0

    # Explicit VMEM budget (v5e's scoped default is only 16 MiB).  All inputs
    # are double-buffered by the pipeline; weights are tiny at these shapes.
    # NOTE(v7x): if D/H scale up, single-buffer the grid-invariant weights
    # (pipeline_mode=pl.Buffered(1)) and/or K-tile with an "arbitrary" axis.
    est = 2 * (batch_tile * D * 4 + batch_tile * C_pad * 4
               + D * num_heads * D * 2 + D * H * 2 + H * C_pad * 2
               + (num_heads * D + H + C_pad) * 4)
    vmem_limit = int(min(max(2 * est, 16 << 20), 64 << 20))

    kernel = functools.partial(san_kernel, num_heads=num_heads, d=D)

    out = pl.pallas_call(
        kernel,
        out_shape=jax.ShapeDtypeStruct((B, C_pad), jnp.float32),
        grid_spec=pltpu.PrefetchScalarGridSpec(
            num_scalar_prefetch=0,
            grid=(B // batch_tile,),
            in_specs=[
                pl.BlockSpec((batch_tile, D), lambda i: (i, 0)),        # x
                pl.BlockSpec((D, num_heads * D), lambda i: (0, 0)),     # whc (bf16)
                pl.BlockSpec((1, num_heads * D), lambda i: (0, 0)),     # bhc
                pl.BlockSpec((D, H), lambda i: (0, 0)),                 # w2 (bf16)
                pl.BlockSpec((1, H), lambda i: (0, 0)),                 # b2
                pl.BlockSpec((H, C_pad), lambda i: (0, 0)),             # w3 (bf16, padded)
                pl.BlockSpec((1, C_pad), lambda i: (0, 0)),             # b3 (padded)
            ],
            out_specs=pl.BlockSpec((batch_tile, C_pad), lambda i: (i, 0)),
        ),
        compiler_params=pltpu.CompilerParams(
            dimension_semantics=("parallel",),
            vmem_limit_bytes=vmem_limit),
    )(x, whc, bhc, w2, b2, w3p, b3p)

    if trim_output:
        return out[:, :num_classes]
    return out   # (B, C_pad); consumer fuses the [:, :C] slice (saves a copy)


def init_params(key, input_size, hidden_layer_size, num_classes, num_heads):
    """Deterministic synthetic parameters (Linear-like fan-in scaling)."""
    keys = jax.random.split(key, 5)

    def lin(kw, kb, fan_in, fan_out):
        bound = 1.0 / jnp.sqrt(jnp.float32(fan_in))
        w = jax.random.uniform(kw, (fan_in, fan_out), jnp.float32, -bound, bound)
        b = jax.random.uniform(kb, (1, fan_out), jnp.float32, -bound, bound)
        return w, b

    head_ws, head_bs = [], []
    head_keys = jax.random.split(keys[0], 2 * num_heads)
    for h in range(num_heads):
        w, b = lin(head_keys[2 * h], head_keys[2 * h + 1], input_size, input_size)
        head_ws.append(w)
        head_bs.append(b)
    wh = jnp.stack(head_ws, axis=0)            # (NH, D, D), already (in, out)
    bh = jnp.stack(head_bs, axis=0)            # (NH, 1, D)

    w2, b2 = lin(keys[1], keys[2], input_size, hidden_layer_size)
    w3, b3 = lin(keys[3], keys[4], hidden_layer_size, num_classes)
    return {"wh": wh, "bh": bh, "w2": w2, "b2": b2, "w3": w3, "b3": b3}


def san_forward_ref(x, params):
    """Pure-JAX f32 reference of the PyTorch forward (inference, dropout=identity)."""
    placeholder = jnp.zeros_like(x)
    for h in range(params["wh"].shape[0]):
        logits = x @ params["wh"][h] + params["bh"][h]
        sm = jax.nn.softmax(logits, axis=1)
        placeholder = jnp.maximum(placeholder, sm * x)
    h2 = placeholder @ params["w2"] + params["b2"]
    act = SELU_SCALE * jnp.where(h2 > 0, h2, SELU_ALPHA * (jnp.exp(h2) - 1.0))
    return act @ params["w3"] + params["b3"]


if __name__ == "__main__":
    batch = 16
    input_size = 16
    hidden = 32
    num_classes = 4
    num_heads = 2

    key = jax.random.PRNGKey(0)
    kx, kp = jax.random.split(key)
    x = jax.random.normal(kx, (batch, input_size), jnp.float32)
    params = init_params(kp, input_size, hidden, num_classes, num_heads)

    # One-time weight fusion / padding / bf16 cast (hoisted out of the hot path),
    # then a single jitted dispatch per call.
    fused = prepare_params(params)
    fused = jax.block_until_ready(fused)
    fwd = jax.jit(functools.partial(san_forward, num_classes=num_classes))

    out = fwd(x, fused)
    out = jax.block_until_ready(out)

    ref = san_forward_ref(x, params)
    assert out.shape == (batch, num_classes)
    # bf16 MXU operands (f32 accumulation) across three chained matmuls:
    # ~1e-2 worst-case deviation vs. the all-f32 reference is expected.
    assert jnp.allclose(out, ref, atol=2e-2, rtol=2e-2), "mismatch vs reference"

    print("KERNEL_OK")
</pallas_src>

<mosaic_0001>
module attributes {stable_mosaic.version = 11 : i64} {
  func.func @san_kernel(%arg0: i32, %arg1: memref<16x16xf32, #tpu.memory_space<vmem>>, %arg2: memref<16x32xbf16, #tpu.memory_space<vmem>>, %arg3: memref<1x32xf32, #tpu.memory_space<vmem>>, %arg4: memref<16x32xbf16, #tpu.memory_space<vmem>>, %arg5: memref<1x32xf32, #tpu.memory_space<vmem>>, %arg6: memref<32x128xbf16, #tpu.memory_space<vmem>>, %arg7: memref<1x128xf32, #tpu.memory_space<vmem>>, %arg8: memref<16x128xf32, #tpu.memory_space<vmem>>) attributes {dimension_semantics = [#tpu.dimension_semantics<parallel>], iteration_bounds = array<i64: 1>, scalar_prefetch = 0 : i64, scratch_operands = 0 : i64, tpu.core_type = #tpu.core_type<tc>, window_params = [{transform_indices = @transform_0, window_bounds = array<i64: 16, 16>}, {pipeline_mode = #tpu.pipeline_mode<synchronous>, transform_indices = @transform_1, window_bounds = array<i64: 16, 32>}, {pipeline_mode = #tpu.pipeline_mode<synchronous>, transform_indices = @transform_2, window_bounds = array<i64: 1, 32>}, {pipeline_mode = #tpu.pipeline_mode<synchronous>, transform_indices = @transform_3, window_bounds = array<i64: 16, 32>}, {pipeline_mode = #tpu.pipeline_mode<synchronous>, transform_indices = @transform_4, window_bounds = array<i64: 1, 32>}, {pipeline_mode = #tpu.pipeline_mode<synchronous>, transform_indices = @transform_5, window_bounds = array<i64: 32, 128>}, {pipeline_mode = #tpu.pipeline_mode<synchronous>, transform_indices = @transform_6, window_bounds = array<i64: 1, 128>}, {transform_indices = @transform_7, window_bounds = array<i64: 16, 128>}]} {
    %c0 = arith.constant 0 : index
    %c0_0 = arith.constant 0 : index
    %0 = vector.load %arg1[%c0, %c0_0] : memref<16x16xf32, #tpu.memory_space<vmem>>, vector<16x16xf32>
    %1 = arith.truncf %0 : vector<16x16xf32> to vector<16x16xbf16>
    %c0_1 = arith.constant 0 : index
    %c0_2 = arith.constant 0 : index
    %2 = vector.load %arg2[%c0_1, %c0_2] : memref<16x32xbf16, #tpu.memory_space<vmem>>, vector<16x32xbf16>
    %cst = arith.constant dense<0.000000e+00> : vector<16x32xf32>
    %3 = tpu.matmul %1, %2, %cst {dimension_numbers = #tpu.dot_dimension_numbers<[1], [0], [0], [1], [0, 0, 1, 1], [], []>} : vector<16x16xbf16>, vector<16x32xbf16>, vector<16x32xf32> -> vector<16x32xf32>
    %c0_3 = arith.constant 0 : index
    %c0_4 = arith.constant 0 : index
    %4 = vector.load %arg3[%c0_3, %c0_4] : memref<1x32xf32, #tpu.memory_space<vmem>>, vector<1x32xf32>
    %5 = vector.broadcast %4 : vector<1x32xf32> to vector<16x32xf32>
    %6 = arith.addf %3, %5 : vector<16x32xf32>
    %cst_5 = arith.constant 0.000000e+00 : f32
    %7 = vector.broadcast %cst_5 : f32 to vector<16x16xf32>
    %8 = vector.extract_strided_slice %6 {offsets = [0, 0], sizes = [16, 16], strides = [1, 1]} : vector<16x32xf32> to vector<16x16xf32>
    %cst_6 = arith.constant dense<0xFF800000> : vector<16xf32>
    %9 = vector.multi_reduction <maximumf>, %8, %cst_6 [1] : vector<16x16xf32> to vector<16xf32>
    %10 = vector.shape_cast %9 : vector<16xf32> to vector<16x1xf32>
    %11 = vector.broadcast %10 : vector<16x1xf32> to vector<16x16xf32>
    %12 = arith.subf %8, %11 : vector<16x16xf32>
    %13 = math.exp %12 : vector<16x16xf32>
    %cst_7 = arith.constant dense<0.000000e+00> : vector<16xf32>
    %14 = vector.multi_reduction <add>, %13, %cst_7 [1] : vector<16x16xf32> to vector<16xf32>
    %15 = vector.shape_cast %14 : vector<16xf32> to vector<16x1xf32>
    %16 = vector.broadcast %15 : vector<16x1xf32> to vector<16x16xf32>
    %17 = arith.divf %13, %16 : vector<16x16xf32>
    %18 = arith.mulf %17, %0 : vector<16x16xf32>
    %19 = arith.maximumf %7, %18 : vector<16x16xf32>
    %20 = vector.extract_strided_slice %6 {offsets = [0, 16], sizes = [16, 16], strides = [1, 1]} : vector<16x32xf32> to vector<16x16xf32>
    %cst_8 = arith.constant dense<0xFF800000> : vector<16xf32>
    %21 = vector.multi_reduction <maximumf>, %20, %cst_8 [1] : vector<16x16xf32> to vector<16xf32>
    %22 = vector.shape_cast %21 : vector<16xf32> to vector<16x1xf32>
    %23 = vector.broadcast %22 : vector<16x1xf32> to vector<16x16xf32>
    %24 = arith.subf %20, %23 : vector<16x16xf32>
    %25 = math.exp %24 : vector<16x16xf32>
    %cst_9 = arith.constant dense<0.000000e+00> : vector<16xf32>
    %26 = vector.multi_reduction <add>, %25, %cst_9 [1] : vector<16x16xf32> to vector<16xf32>
    %27 = vector.shape_cast %26 : vector<16xf32> to vector<16x1xf32>
    %28 = vector.broadcast %27 : vector<16x1xf32> to vector<16x16xf32>
    %29 = arith.divf %25, %28 : vector<16x16xf32>
    %30 = arith.mulf %29, %0 : vector<16x16xf32>
    %31 = arith.maximumf %19, %30 : vector<16x16xf32>
    %32 = arith.truncf %31 : vector<16x16xf32> to vector<16x16xbf16>
    %c0_10 = arith.constant 0 : index
    %c0_11 = arith.constant 0 : index
    %33 = vector.load %arg4[%c0_10, %c0_11] : memref<16x32xbf16, #tpu.memory_space<vmem>>, vector<16x32xbf16>
    %cst_12 = arith.constant dense<0.000000e+00> : vector<16x32xf32>
    %34 = tpu.matmul %32, %33, %cst_12 {dimension_numbers = #tpu.dot_dimension_numbers<[1], [0], [0], [1], [0, 0, 1, 1], [], []>} : vector<16x16xbf16>, vector<16x32xbf16>, vector<16x32xf32> -> vector<16x32xf32>
    %c0_13 = arith.constant 0 : index
    %c0_14 = arith.constant 0 : index
    %35 = vector.load %arg5[%c0_13, %c0_14] : memref<1x32xf32, #tpu.memory_space<vmem>>, vector<1x32xf32>
    %36 = vector.broadcast %35 : vector<1x32xf32> to vector<16x32xf32>
    %37 = arith.addf %34, %36 : vector<16x32xf32>
    %cst_15 = arith.constant 0.000000e+00 : f32
    %38 = vector.broadcast %cst_15 : f32 to vector<16x32xf32>
    %39 = arith.cmpf ogt, %37, %38 : vector<16x32xf32>
    %cst_16 = arith.constant 0.000000e+00 : f32
    %40 = vector.broadcast %cst_16 : f32 to vector<16x32xf32>
    %41 = arith.minimumf %37, %40 : vector<16x32xf32>
    %42 = math.exp %41 : vector<16x32xf32>
    %cst_17 = arith.constant 1.000000e+00 : f32
    %43 = vector.broadcast %cst_17 : f32 to vector<16x32xf32>
    %44 = arith.subf %42, %43 : vector<16x32xf32>
    %cst_18 = arith.constant 1.67326319 : f32
    %45 = vector.broadcast %cst_18 : f32 to vector<16x32xf32>
    %46 = arith.mulf %45, %44 : vector<16x32xf32>
    %47 = arith.select %39, %37, %46 : vector<16x32xi1>, vector<16x32xf32>
    %cst_19 = arith.constant 1.05070102 : f32
    %48 = vector.broadcast %cst_19 : f32 to vector<16x32xf32>
    %49 = arith.mulf %48, %47 : vector<16x32xf32>
    %50 = arith.truncf %49 : vector<16x32xf32> to vector<16x32xbf16>
    %c0_20 = arith.constant 0 : index
    %c0_21 = arith.constant 0 : index
    %51 = vector.load %arg6[%c0_20, %c0_21] : memref<32x128xbf16, #tpu.memory_space<vmem>>, vector<32x128xbf16>
    %cst_22 = arith.constant dense<0.000000e+00> : vector<16x128xf32>
    %52 = tpu.matmul %50, %51, %cst_22 {dimension_numbers = #tpu.dot_dimension_numbers<[1], [0], [0], [1], [0, 0, 1, 1], [], []>} : vector<16x32xbf16>, vector<32x128xbf16>, vector<16x128xf32> -> vector<16x128xf32>
    %c0_23 = arith.constant 0 : index
    %c0_24 = arith.constant 0 : index
    %53 = vector.load %arg7[%c0_23, %c0_24] : memref<1x128xf32, #tpu.memory_space<vmem>>, vector<1x128xf32>
    %54 = vector.broadcast %53 : vector<1x128xf32> to vector<16x128xf32>
    %55 = arith.addf %52, %54 : vector<16x128xf32>
    %c0_25 = arith.constant 0 : index
    %c0_26 = arith.constant 0 : index
    %56 = vector.load %arg8[%c0_25, %c0_26] : memref<16x128xf32, #tpu.memory_space<vmem>>, vector<16x128xf32>
    tpu.vector_store %arg8[%c0_25, %c0_26], %55 {strides = array<i32>} : memref<16x128xf32, #tpu.memory_space<vmem>>, vector<16x128xf32>,
    return
  }
  func.func @transform_0(%arg0: i32) -> (i32, i32) {
    %c0_i32 = arith.constant 0 : i32
    %c0_i32_0 = arith.constant 0 : i32
    return %arg0, %c0_i32 : i32, i32
  }
  func.func @transform_1(%arg0: i32) -> (i32, i32) {
    %c0_i32 = arith.constant 0 : i32
    %c0_i32_0 = arith.constant 0 : i32
    %c0_i32_1 = arith.constant 0 : i32
    return %c0_i32, %c0_i32_0 : i32, i32
  }
  func.func @transform_2(%arg0: i32) -> (i32, i32) {
    %c0_i32 = arith.constant 0 : i32
    %c0_i32_0 = arith.constant 0 : i32
    %c0_i32_1 = arith.constant 0 : i32
    return %c0_i32, %c0_i32_0 : i32, i32
  }
  func.func @transform_3(%arg0: i32) -> (i32, i32) {
    %c0_i32 = arith.constant 0 : i32
    %c0_i32_0 = arith.constant 0 : i32
    %c0_i32_1 = arith.constant 0 : i32
    return %c0_i32, %c0_i32_0 : i32, i32
  }
  func.func @transform_4(%arg0: i32) -> (i32, i32) {
    %c0_i32 = arith.constant 0 : i32
    %c0_i32_0 = arith.constant 0 : i32
    %c0_i32_1 = arith.constant 0 : i32
    return %c0_i32, %c0_i32_0 : i32, i32
  }
  func.func @transform_5(%arg0: i32) -> (i32, i32) {
    %c0_i32 = arith.constant 0 : i32
    %c0_i32_0 = arith.constant 0 : i32
    %c0_i32_1 = arith.constant 0 : i32
    return %c0_i32, %c0_i32_0 : i32, i32
  }
  func.func @transform_6(%arg0: i32) -> (i32, i32) {
    %c0_i32 = arith.constant 0 : i32
    %c0_i32_0 = arith.constant 0 : i32
    %c0_i32_1 = arith.constant 0 : i32
    return %c0_i32, %c0_i32_0 : i32, i32
  }
  func.func @transform_7(%arg0: i32) -> (i32, i32) {
    %c0_i32 = arith.constant 0 : i32
    %c0_i32_0 = arith.constant 0 : i32
    return %arg0, %c0_i32 : i32, i32
  }
}

</mosaic_0001>

<bundles_post_ra>
// kernel: san_forward.1
= control target key start
LH: loop header
LB: loop body
LE: loop exit
PB: predicated region body
PF: predicated region fallthrough
CT: control target
= control target key end

     0   :  { %12 = vsyncpa [#allocation3], 0  ;;  %s700_s0 = inlined_call_operand.hbm [shape: f32[16,16], index: 0, kind: input, shape index: {}]   ;;  %s701_s1 = inlined_call_operand.hbm [shape: bf16[16,32], index: 1, kind: input, shape index: {}]   ;;  %s702_s2 = inlined_call_operand.vmem [shape: f32[1,32], index: 2, kind: input, shape index: {}]   ;;  %s703_s3 = inlined_call_operand.hbm [shape: bf16[16,32], index: 3, kind: input, shape index: {}]   ;;  %s704_s4 = inlined_call_operand.vmem [shape: f32[1,32], index: 4, kind: input, shape index: {}]   ;;  %s705_s5 = inlined_call_operand.vmem [shape: bf16[32,128], index: 5, kind: input, shape index: {}]   ;;  %s706_s6 = inlined_call_operand.hbm [shape: f32[1,128], index: 6, kind: input, shape index: {}]   ;;  %s707_s7 = inlined_call_operand.vmem [shape: f32[16,128], index: 7, kind: output, shape index: {}]  }
   0x1   :  { %13 = vsyncpa [#allocation5], 0 }
   0x2   :  { %14 = vsyncpa [#allocation8], 0  ;;  %s548_s24 = smov [#allocation4]   ;;  %s454_s28 = scalar_lea.hbm %s701_s1, 128 }
   0x3   :  { %s32_s25 = sshll.u32 %s548_s24, 4  ;;  %p455_p0 = scmp.ne.s32.totalorder %s701_s1, %s454_s28  ;;  %s33_s25 = int_to_ptr.vmem [resolvable:$true] %s32_s25 }
   0x4   :  { %p458_p1 = scmp.lt.u32.totalorder %s454_s28, %s701_s1 }
   0x6   :  { %p460_p2 = pnand %p458_p1, %p455_p0 }
   0x8   :  { %463 = shalt.err (!%p460_p2)
}
   0x9   :  { %s464_s10 = scalar_lea.vmem %s33_s25, 128  ;;  %p469_p4 = scmp.lt.s32.totalorder %s33_s25, %s33_s25 }
   0xa   :  { %p465_p3 = scmp.ne.s32.totalorder %s33_s25, %s464_s10  ;;  %p470_p5 = scmp.lt.s32.totalorder %s464_s10, %s464_s10 }
   0xc   :  { %p471_p6 = por %p470_p5, %p469_p4 }
   0xe   :  { %p472_p7 = pnand %p471_p6, %p465_p3 }
  0x10   :  { %475 = shalt.err (!%p472_p7)
}
  0x11   :  { %s549_s11 = smov 64   ;;  %s550_s12 = smov 4  }
  0x12   :  { %38 = dma.hbm_to_vmem [thread:$0]  %s701_s1, 128, %s33_s25, [#allocation5], %s549_s11, %s549_s11, %s550_s12  }
  0x13   :  { %s551_s15 = smov [#allocation2]   ;;  %s476_s19 = scalar_lea.hbm %s700_s0, 256 }
  0x14   :  { %s20_s16 = sshll.u32 %s551_s15, 4  ;;  %p477_p8 = scmp.ne.s32.totalorder %s700_s0, %s476_s19  ;;  %s21_s16 = int_to_ptr.vmem [resolvable:$true] %s20_s16 }
  0x15   :  { %p480_p9 = scmp.lt.u32.totalorder %s476_s19, %s700_s0 }
  0x17   :  { %p482_p10 = pnand %p480_p9, %p477_p8 }
  0x19   :  { %485 = shalt.err (!%p482_p10)
}
  0x1a   :  { %s486_s24 = scalar_lea.vmem %s21_s16, 256  ;;  %p491_p12 = scmp.lt.s32.totalorder %s21_s16, %s21_s16 }
  0x1b   :  { %p487_p11 = scmp.ne.s32.totalorder %s21_s16, %s486_s24  ;;  %p492_p13 = scmp.lt.s32.totalorder %s486_s24, %s486_s24 }
  0x1d   :  { %p493_p0 = por %p492_p13, %p491_p12 }
  0x1f   :  { %p494_p1 = pnand %p493_p0, %p487_p11 }
  0x21   :  { %497 = shalt.err (!%p494_p1)
}
  0x22   :  { %s552_s1 = smov 128   ;;  %s553_s25 = smov 8  }
  0x23   :  { %26 = dma.hbm_to_vmem [thread:$0]  %s700_s0, 256, %s21_s16, [#allocation3], %s552_s1, %s552_s1, %s553_s25  }
  0x24   :  { %s554_s28 = smov [#allocation6]   ;;  %s555_s30 = smov [#allocation7]  }
  0x25   :  { %s46_s29 = sshll.u32 %s554_s28, 4  ;;  %s63_s8 = sshll.u32 %s555_s30, 4  ;;  %s47_s29 = int_to_ptr.vmem [resolvable:$true] %s46_s29  ;;  %s64_s8 = int_to_ptr.vmem [resolvable:$true] %s63_s8 }
  0x26   :  { %s498_s13 = scalar_lea.hbm %s703_s3, 128 }
  0x27   :  { %p499_p2 = scmp.ne.s32.totalorder %s703_s3, %s498_s13  ;;  %p502_p3 = scmp.lt.u32.totalorder %s498_s13, %s703_s3 }
  0x29   :  { %p504_p4 = pnand %p502_p3, %p499_p2 }
  0x2b   :  { %507 = shalt.err (!%p504_p4)
}
  0x2c   :  { %s508_s0 = scalar_lea.vmem %s47_s29, 128  ;;  %p513_p6 = scmp.lt.s32.totalorder %s47_s29, %s47_s29 }
  0x2d   :  { %p509_p5 = scmp.ne.s32.totalorder %s47_s29, %s508_s0  ;;  %p514_p7 = scmp.lt.s32.totalorder %s508_s0, %s508_s0 }
  0x2f   :  { %p515_p8 = por %p514_p7, %p513_p6 }
  0x31   :  { %p516_p9 = pnand %p515_p8, %p509_p5 }
  0x33   :  { %519 = shalt.err (!%p516_p9)
}
  0x34   :  { %52 = dma.hbm_to_vmem [thread:$0]  %s703_s3, 128, %s47_s29, [#allocation5], %s549_s11, %s549_s11, %s550_s12  }
  0x35   :  { %s520_s22 = scalar_lea.hbm %s706_s6, 16 }
  0x36   :  { %p521_p10 = scmp.ne.s32.totalorder %s706_s6, %s520_s22  ;;  %p524_p11 = scmp.lt.u32.totalorder %s520_s22, %s706_s6 }
  0x38   :  { %p526_p12 = pnand %p524_p11, %p521_p10 }
  0x3a   :  { %529 = shalt.err (!%p526_p12)
}
  0x3b   :  { %s530_s26 = scalar_lea.vmem %s64_s8, 16  ;;  %s534_s27 = scalar_lea.vmem %s64_s8, 32 }
  0x3c   :  { %p531_p13 = scmp.ne.s32.totalorder %s64_s8, %s530_s26  ;;  %p535_p0 = scmp.lt.s32.totalorder %s64_s8, %s64_s8 }
  0x3d   :  { %p536_p1 = scmp.lt.s32.totalorder %s534_s27, %s530_s26 }
  0x3f   :  { %p537_p2 = por %p536_p1, %p535_p0 }
  0x41   :  { %p538_p3 = pnand %p537_p2, %p531_p13 }
  0x43   :  { %541 = shalt.err (!%p538_p3)
}
  0x44   :  { %66 = dma.hbm_to_vmem [thread:$0]  %s706_s6, 16, %s64_s8, [#allocation8]  }
  0x45   :  { %542 = dma.done.wait [#allocation3], 256  }
  0x46   :  { %543 = vsyncadd [#allocation3], 4294967040 }
  0x47   :  { %544 = dma.done.wait [#allocation5], 256  }
  0x48   :  { %545 = vsyncadd [#allocation5], 4294967040 }
  0x49   :  { %546 = dma.done.wait [#allocation8], 16  }
  0x4a   :  { %547 = vsyncadd [#allocation8], 4294967280  ;;  %v556_v0 = vmov 0.0   ;;  %vm557_vm0 = vmmov 0   ;;  %v430_v1 = vld [vmem:[#allocation4] sm:$0xff]   ;;  %v658_v2 = vld [vmem:[#allocation2] sm:$0xff] }
  0x4b   :  { %393 = vmatprep.subr.bf16.mxu0 %v556_v0  ;;  %395 = vmatprep.mubr.msk.bf16.mxu0 %vm557_vm0, %v556_v0  ;;  %v660_v3 = vld [vmem:[#allocation2 + $0x8] sm:$0xff]  ;;  %vm98_vm1 = vcmask 130048   ;;  %v374_v5 = vld [vmem:[%s702_s2] ss:$0 sm:$0xff]  ;;  %vm169_vm2 = vcmask 261248   ;;  %s558_s28 = smov 16  }
  0x4c   :  { %399 = vmatprep.subr.bf16.mxu1 %v556_v0  ;;  %401 = vmatprep.mubr.msk.bf16.mxu1 %vm557_vm0, %v556_v0  ;;  %v82_v4 = vpack.c.bf16 %v660_v3, %v658_v2  ;;  %s559_s2 = smov 112   ;;  %v431_v42 = vld [vmem:[#allocation6] sm:$0xff]   ;;  %vm320_vm5 = vcmask 261120  }
  0x4d   :  { %394 = vmatpush3.bf16.msra.mxu0 %v430_v1  ;;  %400 = vmatpush3.bf16.msra.mxu1 %v431_v42 }
  0x4e   :  { %405 = vmatprep.subr.bf16.mxu0 %v556_v0 }
  0x50   :  { %396 = vmatmul.mubr.msk.bf16.vlgmr.msra.gmra.mrb[0].mxu0 %vm98_vm1, %v82_v4 }
  0x51   :  { %409 = vmatprep.mubr.msk.bf16.mxu0 %vm557_vm0, %v556_v0 }
 0x123   :  { %v136_v6 = vpop.f32.mrb[0].mxu0 }
 0x124   :  { %v137_v7 = vadd.f32 %v374_v5, %v136_v6  ;;  %v397_v8 = vpop.f32.mrb[1].mxu0 }
 0x125   :  { %v139_v9 = vpop.f32.mrb[2].mxu0 }
 0x126   :  { %v140_v10 = vadd.f32 %v374_v5, %v139_v9  ;;  %v398_v11 = vpop.f32.mrb[3].mxu0  ;;  %v170_v12 = vsel %vm169_vm2, %v137_v7, -inf  ;;  %v143_v14 = vsel %vm98_vm1, %v137_v7, -inf  ;;  %v432_v5 = vld [vmem:[%s705_s5] sm:$0xff]  }
 0x127   :  { %171 = vmax.xlane.f32.xlu0 %v170_v12  ;;  %406 = vmatpush3.bf16.msra.mxu0 %v432_v5 }
 0x128   :  { %v173_v13 = vsel %vm169_vm2, %v140_v10, -inf  ;;  %v146_v26 = vsel %vm98_vm1, %v140_v10, -inf  ;;  %407 = vmatprep.subr.bf16.mxu0 %v556_v0 }
 0x12b   :  { %174 = vmax.xlane.f32.xlu0 %v173_v13 }
 0x12f   :  { %144 = vmax.xlane.f32.xlu0 %v143_v14 }
 0x145   :  { %202 = vrot.lane.b32.xlu0 %v658_v2, %s558_s28 }
 0x1b4   :  { %v172_v15 = vpop.xlane.xlu0 %171 }
 0x1b5   :  { %v176_v16 = vsub.f32 %v137_v7, %v172_v15 }
 0x1b7   :  { %v178_v17 = vmul.f32 1.442695, %v176_v16 }
 0x1b8   :  { %v175_v18 = vpop.xlane.xlu0 %174 }
 0x1b9   :  { %434 = vpow2.f32 %v178_v17  ;;  %v177_v19 = vsub.f32 %v140_v10, %v175_v18 }
 0x1bb   :  { %v180_v20 = vmul.f32 1.442695, %v177_v19 }
 0x1bc   :  { %v145_v23 = vpop.xlane.xlu0 %144 }
 0x1bd   :  { %436 = vpow2.f32 %v180_v20  ;;  %v149_v24 = vsub.f32 %v137_v7, %v145_v23 }
 0x1bf   :  { %v151_v25 = vmul.f32 1.442695, %v149_v24 }
 0x1c0   :  { %v203_v38 = vpop.permute.xlu0 %202 }
 0x1c1   :  { %438 = vpow2.f32 %v151_v25 }
 0x1c3   :  { %v435_v21 = vpop.eup %434 }
 0x1c4   :  { %184 = vrot.lane.b32.xlu1 %v435_v21, %s559_s2 }
 0x1c7   :  { %v437_v22 = vpop.eup %436 }
 0x1c8   :  { %186 = vrot.lane.b32.xlu1 %v437_v22, %s559_s2 }
 0x1cb   :  { %v439_v27 = vpop.eup %438 }
 0x1cc   :  { %v155_v28 = vsel %vm98_vm1, %v439_v27, 0.0 }
 0x1ec   :  { %147 = vmax.xlane.f32.xlu1 %v146_v26  ;;  %v382_v26 = vld [vmem:[#allocation7] ss:$0 sm:$0xff] }
 0x1f0   :  { %156 = vadd.xlane.f32.xlu1 %v155_v28 }
 0x236   :  { %v185_v29 = vpop.permute.xlu1 %184 }
 0x237   :  { %v190_v30 = vsel %vm98_vm1, %v185_v29, 0.0 }
 0x238   :  { %191 = vadd.xlane.f32.xlu0 %v190_v30 }
 0x23a   :  { %v187_v31 = vpop.permute.xlu1 %186 }
 0x23b   :  { %v193_v32 = vsel %vm98_vm1, %v187_v31, 0.0 }
 0x23c   :  { %194 = vadd.xlane.f32.xlu0 %v193_v32 }
 0x252   :  { %204 = vrot.lane.b32.xlu0 %v660_v3, %s558_s28 }
 0x279   :  { %v148_v33 = vpop.xlane.xlu1 %147 }
 0x27a   :  { %v150_v34 = vsub.f32 %v140_v10, %v148_v33 }
 0x27c   :  { %v153_v35 = vmul.f32 1.442695, %v150_v34 }
 0x27d   :  { %v157_v50 = vpop.xlane.xlu1 %156 }
 0x27e   :  { %440 = vpow2.f32 %v153_v35 }
 0x288   :  { %v441_v36 = vpop.eup %440 }
 0x289   :  { %v158_v37 = vsel %vm98_vm1, %v441_v36, 0.0 }
 0x28a   :  { %159 = vadd.xlane.f32.xlu0 %v158_v37 }
 0x2c5   :  { %v192_v39 = vpop.xlane.xlu0 %191 }
 0x2c6   :  { %442 = vrcp.f32 %v192_v39 }
 0x2c9   :  { %v195_v40 = vpop.xlane.xlu0 %194 }
 0x2ca   :  { %444 = vrcp.f32 %v195_v40 }
 0x2cb   :  { %446 = vrcp.f32 %v157_v50 }
 0x2cd   :  { %v205_v45 = vpop.permute.xlu0 %204 }
 0x2d0   :  { %v443_v41 = vpop.eup %442 }
 0x2d1   :  { %v197_v43 = vmul.f32 %v443_v41, %v435_v21 }
 0x2d3   :  { %v208_v47 = vmul.f32 %v203_v38, %v197_v43 }
 0x2d4   :  { %v445_v44 = vpop.eup %444 }
 0x2d5   :  { %v199_v46 = vmul.f32 %v445_v44, %v437_v22  ;;  %v447_v52 = vpop.eup %446 }
 0x2d6   :  { %v162_v54 = vmul.f32 %v447_v52, %v439_v27 }
 0x2d7   :  { %v209_v48 = vmul.f32 %v205_v45, %v199_v46 }
 0x2d8   :  { %v165_v56 = vmul.f32 %v162_v54, %v658_v2  ;;  %v433_v2 = vld [vmem:[%s705_s5 + $0x8] sm:$0xff]  }
 0x2d9   :  { %v425_v49 = vpack.i.bf16 %v209_v48, %v208_v47  ;;  %408 = vmatpush3.bf16.msra.mxu0 %v433_v2 }
 0x2da   :  { %v167_v59 = vmax.f32 %v165_v56, 0.0 }
 0x2db   :  { %426 = vrot.lane.b32.xlu1 %v425_v49, %s559_s2 }
 0x317   :  { %v160_v51 = vpop.xlane.xlu0 %159 }
 0x318   :  { %448 = vrcp.f32 %v160_v51 }
 0x322   :  { %v449_v53 = vpop.eup %448 }
 0x323   :  { %v164_v55 = vmul.f32 %v449_v53, %v441_v36 }
 0x325   :  { %v166_v57 = vmul.f32 %v164_v55, %v660_v3  ;;  %v377_v3 = vld [vmem:[%s704_s4] ss:$0 sm:$0xff] }
 0x327   :  { %v168_v60 = vmax.f32 %v166_v57, 0.0 }
 0x34d   :  { %v427_v58 = vpop.permute.xlu1 %426 }
 0x34e   :  { %v429_v61 = vunpack.i.h.bf16 %v427_v58  ;;  %v428_v62 = vunpack.i.l.bf16 %v427_v58 }
 0x350   :  { %v219_v63 = vmax.f32 %v168_v60, %v429_v61  ;;  %v218_v1 = vmax.f32 %v167_v59, %v428_v62 }
 0x352   :  { %v220_v4 = vpack.c.bf16 %v219_v63, %v218_v1 }
 0x354   :  { %402 = vmatmul.mubr.msk.bf16.vlgmr.msra.gmra.mrb[0].mxu1 %vm98_vm1, %v220_v4 }
 0x427   :  { %v273_v6 = vpop.f32.mrb[0].mxu1 }
 0x428   :  { %v274_v7 = vadd.f32 %v377_v3, %v273_v6  ;;  %v403_v8 = vpop.f32.mrb[1].mxu1 }
 0x429   :  { %v276_v9 = vpop.f32.mrb[2].mxu1 }
 0x42a   :  { %v282_v10 = vmin.f32 %v274_v7, 0.0  ;;  %v277_v11 = vadd.f32 %v377_v3, %v276_v9  ;;  %v404_v12 = vpop.f32.mrb[3].mxu1  ;;  %vm280_vm3 = vcmp.gt.f32.partialorder %v274_v7, 0.0 }
 0x42c   :  { %v284_v13 = vmul.f32 1.442695, %v282_v10  ;;  %v283_v14 = vmin.f32 %v277_v11, 0.0  ;;  %vm281_vm4 = vcmp.gt.f32.partialorder %v277_v11, 0.0 }
 0x42e   :  { %450 = vpow2.f32 %v284_v13  ;;  %v286_v0 = vmul.f32 1.442695, %v283_v14 }
 0x430   :  { %452 = vpow2.f32 %v286_v0 }
 0x438   :  { %v451_v15 = vpop.eup %450 }
 0x439   :  { %v380_v16 = vadd.f32 -1.0, %v451_v15 }
 0x43a   :  { %v453_v17 = vpop.eup %452 }
 0x43b   :  { %v290_v18 = vmul.f32 1.6732632, %v380_v16  ;;  %v381_v19 = vadd.f32 -1.0, %v453_v17 }
 0x43d   :  { %v292_v20 = vsel %vm280_vm3, %v274_v7, %v290_v18  ;;  %v291_v21 = vmul.f32 1.6732632, %v381_v19 }
 0x43e   :  { %v294_v23 = vmul.f32 1.050701, %v292_v20 }
 0x43f   :  { %v293_v22 = vsel %vm281_vm4, %v277_v11, %v291_v21 }
 0x440   :  { %v295_v24 = vmul.f32 1.050701, %v293_v22 }
 0x442   :  { %v296_v25 = vpack.c.bf16 %v295_v24, %v294_v23 }
 0x444   :  { %410 = vmatmul.mubr.msk.bf16.vlgmr.msra.gmra.mrb[4].mxu0 %vm320_vm5, %v296_v25 }
 0x517   :  { %v358_v27 = vpop.f32.mrb[4].mxu0 }
 0x518   :  { %v359_v28 = vadd.f32 %v382_v26, %v358_v27  ;;  %v411_v29 = vpop.f32.mrb[5].mxu0 }
 0x519   :  { %v361_v30 = vpop.f32.mrb[6].mxu0 }
 0x51a   :  { %365 = vst [vmem:[%s707_s7] sm:$0xff] %v359_v28  ;;  %v362_v31 = vadd.f32 %v382_v26, %v361_v30  ;;  %v412_v32 = vpop.f32.mrb[7].mxu0 }
 0x51c   :  { %366 = vst [vmem:[%s707_s7 + $0x8] sm:$0xff] %v362_v31 }
 0x51d   :  { %371 = vsyncpa [#allocation3], 1 }
 0x51e   :  { %372 = vsyncpa [#allocation5], 1 }
 0x51f   :  { %373 = vsyncpa [#allocation8], 1 }

</bundles_post_ra>
